<compile_context>
chip_gen: v7x
topology: tpu7x:2x2x1
jax: 0.10.0
libtpu: 0.0.40
codegen_flags: <defaults>
</compile_context>

<pallas_src>
import jax
import jax.numpy as jnp
from jax import lax
from jax.experimental import pallas as pl
from jax.experimental.pallas import tpu as pltpu

LANE = 128
SUBLANE = 8
TB_MAX = 512  # batch-tile sweep point; ~0.25 MiB of pipelined VMEM at these dims


def _round_up(v, m):
    return ((v + m - 1) // m) * m


def fc_kernel(x_ref, w1_ref, b1_ref, w2_ref, b2_ref, o_ref):
    # Layer 1: x @ W1p + b1, ReLU.  Everything stays f32; HIGHEST pins exact-f32
    # MXU passes (free here — the kernel is HBM/overhead bound, not MXU bound).
    h = jnp.dot(x_ref[...], w1_ref[...],
                preferred_element_type=jnp.float32,
                precision=lax.Precision.HIGHEST)
    h = jnp.maximum(h + b1_ref[...], 0.0)          # b1 is [1, Hp] -> row broadcast
    # Layer 2: h @ W2p + b2.  Output block is [tb, D_out] (full-extent last dim):
    # stores are masked when D_out < 128, but HBM write bytes are the true
    # D_out lanes only, and there is no post-kernel slice pass.
    y = jnp.dot(h, w2_ref[...],
                preferred_element_type=jnp.float32,
                precision=lax.Precision.HIGHEST)
    o_ref[...] = (y + b2_ref[...]).astype(o_ref.dtype)


def prepare_params(w1, b1, w2, b2):
    """One-time relayout of torch-convention params (nn.Linear stores [out, in]).

    w1: [H, D_in], b1: [H], w2: [D_out, H], b2: [D_out].
    Returns matmul-layout params:
      w1p [D_in, Hp]  (H zero-padded to a 128 multiple -> lane-dense h),
      b1p [1, Hp], w2p [Hp, D_out], b2p [1, D_out].
    Padding is exact zeros: padded hidden units give ReLU(0+0)=0 and the padded
    W2 rows are zero, so they contribute nothing to the real outputs.
    """
    H, D_in = w1.shape
    D_out = w2.shape[0]
    Hp = _round_up(H, LANE)
    dt = w1.dtype
    w1p = jnp.zeros((D_in, Hp), dt).at[:, :H].set(w1.T)
    b1p = jnp.zeros((1, Hp), dt).at[0, :H].set(b1)
    w2p = jnp.zeros((Hp, D_out), dt).at[:H, :].set(w2.T)
    b2p = b2.reshape(1, D_out).astype(dt)
    return w1p, b1p, w2p, b2p


def _pick_tb(B):
    # Big tiles amortize the per-grid-step overhead and make each x/out DMA
    # large enough to approach HBM bandwidth; but once B is nontrivial keep the
    # grid >= 2 steps so the 'parallel' batch axis can shard across both v7x TCs.
    if B <= LANE:
        return _round_up(max(B, SUBLANE), SUBLANE)
    tb = min(TB_MAX, _round_up(pl.cdiv(B, 2), SUBLANE))
    return max(tb, LANE)


@jax.jit
def fc_model(x, w1p, b1p, w2p, b2p):
    """x: [B, D_in]; padded params from prepare_params(); returns [B, D_out]."""
    B, D_in = x.shape
    Hp = w1p.shape[1]
    D_out = w2p.shape[1]
    tb = _pick_tb(B)

    # No host-side zero-pad of x and no post-kernel slice: grid = cdiv(B, tb),
    # Pallas pads the ragged last block (junk input rows only reach output rows
    # past B, whose stores are masked off by Pallas).
    return pl.pallas_call(
        fc_kernel,
        out_shape=jax.ShapeDtypeStruct((B, D_out), x.dtype),
        grid=(pl.cdiv(B, tb),),
        in_specs=[
            pl.BlockSpec((tb, D_in), lambda i: (i, 0)),   # x tile marches over B
            # Constant index_maps keep the (tiny) weights/biases VMEM-resident
            # across the whole grid.  (pl.Buffered(1) would also drop their
            # second pipeline buffer; skipped — ~25 KiB here, irrelevant.)
            pl.BlockSpec((D_in, Hp), lambda i: (0, 0)),
            pl.BlockSpec((1, Hp), lambda i: (0, 0)),
            pl.BlockSpec((Hp, D_out), lambda i: (0, 0)),
            pl.BlockSpec((1, D_out), lambda i: (0, 0)),
        ],
        out_specs=pl.BlockSpec((tb, D_out), lambda i: (i, 0)),
        compiler_params=pltpu.CompilerParams(
            dimension_semantics=("parallel",)),
    )(x, w1p, b1p, w2p, b2p)


if __name__ == "__main__":
    # Small-but-nontrivial batch: 2 grid steps with a ragged last block, which
    # exercises the no-host-pad / masked-store path.
    B, D_in, H, D_out = 250, 32, 64, 16

    key = jax.random.PRNGKey(0)
    kx, kw1, kb1, kw2, kb2 = jax.random.split(key, 5)

    x = jax.random.normal(kx, (B, D_in), dtype=jnp.float32)
    # Synthetic params in torch.nn.Linear layout ([out, in]).
    w1 = jax.random.normal(kw1, (H, D_in), dtype=jnp.float32) * 0.1
    b1 = jax.random.normal(kb1, (H,), dtype=jnp.float32) * 0.1
    w2 = jax.random.normal(kw2, (D_out, H), dtype=jnp.float32) * 0.1
    b2 = jax.random.normal(kb2, (D_out,), dtype=jnp.float32) * 0.1

    # One-time relayout (outside the per-call path).
    w1p, b1p, w2p, b2p = prepare_params(w1, b1, w2, b2)

    y = fc_model(x, w1p, b1p, w2p, b2p)
    jax.block_until_ready(y)

    # Pure-JAX reference (torch semantics: x @ W^T + b, ReLU, x @ W^T + b),
    # pinned to the same exact-f32 matmul precision as the kernel.
    h_ref = jnp.maximum(
        jnp.dot(x, w1.T, precision=lax.Precision.HIGHEST) + b1, 0.0)
    y_ref = jnp.dot(h_ref, w2.T, precision=lax.Precision.HIGHEST) + b2
    assert y.shape == y_ref.shape, (y.shape, y_ref.shape)
    assert jnp.allclose(y, y_ref, atol=1e-5, rtol=1e-5), "mismatch vs reference"

    print("KERNEL_OK")
</pallas_src>

<mosaic_0001>
module attributes {stable_mosaic.version = 11 : i64} {
  func.func @fc_kernel(%arg0: i32, %arg1: memref<128x32xf32, #tpu.memory_space<vmem>>, %arg2: memref<32x128xf32, #tpu.memory_space<vmem>>, %arg3: memref<1x128xf32, #tpu.memory_space<vmem>>, %arg4: memref<128x16xf32, #tpu.memory_space<vmem>>, %arg5: memref<1x16xf32, #tpu.memory_space<vmem>>, %arg6: memref<128x16xf32, #tpu.memory_space<vmem>>) attributes {dimension_semantics = [#tpu.dimension_semantics<parallel>], iteration_bounds = array<i64: 2>, scalar_prefetch = 0 : i64, scratch_operands = 0 : i64, tpu.core_type = #tpu.core_type<tc>, window_params = [{transform_indices = @transform_0, window_bounds = array<i64: 128, 32>}, {pipeline_mode = #tpu.pipeline_mode<synchronous>, transform_indices = @transform_1, window_bounds = array<i64: 32, 128>}, {pipeline_mode = #tpu.pipeline_mode<synchronous>, transform_indices = @transform_2, window_bounds = array<i64: 1, 128>}, {pipeline_mode = #tpu.pipeline_mode<synchronous>, transform_indices = @transform_3, window_bounds = array<i64: 128, 16>}, {pipeline_mode = #tpu.pipeline_mode<synchronous>, transform_indices = @transform_4, window_bounds = array<i64: 1, 16>}, {transform_indices = @transform_5, window_bounds = array<i64: 128, 16>}]} {
    %c0 = arith.constant 0 : index
    %c0_0 = arith.constant 0 : index
    %0 = vector.load %arg1[%c0, %c0_0] : memref<128x32xf32, #tpu.memory_space<vmem>>, vector<128x32xf32>
    %c0_1 = arith.constant 0 : index
    %c0_2 = arith.constant 0 : index
    %1 = vector.load %arg2[%c0_1, %c0_2] : memref<32x128xf32, #tpu.memory_space<vmem>>, vector<32x128xf32>
    %cst = arith.constant dense<0.000000e+00> : vector<128x128xf32>
    %2 = tpu.matmul %0, %1, %cst {dimension_numbers = #tpu.dot_dimension_numbers<[1], [0], [0], [1], [0, 0, 1, 1], [], []>, precision = #tpu.contract_precision<fp32>} : vector<128x32xf32>, vector<32x128xf32>, vector<128x128xf32> -> vector<128x128xf32>
    %c0_3 = arith.constant 0 : index
    %c0_4 = arith.constant 0 : index
    %3 = vector.load %arg3[%c0_3, %c0_4] : memref<1x128xf32, #tpu.memory_space<vmem>>, vector<1x128xf32>
    %4 = vector.broadcast %3 : vector<1x128xf32> to vector<128x128xf32>
    %5 = arith.addf %2, %4 : vector<128x128xf32>
    %cst_5 = arith.constant 0.000000e+00 : f32
    %6 = vector.broadcast %cst_5 : f32 to vector<128x128xf32>
    %7 = arith.maximumf %5, %6 : vector<128x128xf32>
    %c0_6 = arith.constant 0 : index
    %c0_7 = arith.constant 0 : index
    %8 = vector.load %arg4[%c0_6, %c0_7] : memref<128x16xf32, #tpu.memory_space<vmem>>, vector<128x16xf32>
    %cst_8 = arith.constant dense<0.000000e+00> : vector<128x16xf32>
    %9 = tpu.matmul %7, %8, %cst_8 {dimension_numbers = #tpu.dot_dimension_numbers<[1], [0], [0], [1], [0, 0, 1, 1], [], []>, precision = #tpu.contract_precision<fp32>} : vector<128x128xf32>, vector<128x16xf32>, vector<128x16xf32> -> vector<128x16xf32>
    %c0_9 = arith.constant 0 : index
    %c0_10 = arith.constant 0 : index
    %10 = vector.load %arg5[%c0_9, %c0_10] : memref<1x16xf32, #tpu.memory_space<vmem>>, vector<1x16xf32>
    %11 = vector.broadcast %10 : vector<1x16xf32> to vector<128x16xf32>
    %12 = arith.addf %9, %11 : vector<128x16xf32>
    %c0_11 = arith.constant 0 : index
    %c0_12 = arith.constant 0 : index
    %13 = vector.load %arg6[%c0_11, %c0_12] : memref<128x16xf32, #tpu.memory_space<vmem>>, vector<128x16xf32>
    tpu.vector_store %arg6[%c0_11, %c0_12], %12 {strides = array<i32>} : memref<128x16xf32, #tpu.memory_space<vmem>>, vector<128x16xf32>,
    return
  }
  func.func @transform_0(%arg0: i32) -> (i32, i32) {
    %c0_i32 = arith.constant 0 : i32
    %c0_i32_0 = arith.constant 0 : i32
    return %arg0, %c0_i32 : i32, i32
  }
  func.func @transform_1(%arg0: i32) -> (i32, i32) {
    %c0_i32 = arith.constant 0 : i32
    %c0_i32_0 = arith.constant 0 : i32
    %c0_i32_1 = arith.constant 0 : i32
    return %c0_i32, %c0_i32_0 : i32, i32
  }
  func.func @transform_2(%arg0: i32) -> (i32, i32) {
    %c0_i32 = arith.constant 0 : i32
    %c0_i32_0 = arith.constant 0 : i32
    %c0_i32_1 = arith.constant 0 : i32
    return %c0_i32, %c0_i32_0 : i32, i32
  }
  func.func @transform_3(%arg0: i32) -> (i32, i32) {
    %c0_i32 = arith.constant 0 : i32
    %c0_i32_0 = arith.constant 0 : i32
    %c0_i32_1 = arith.constant 0 : i32
    return %c0_i32, %c0_i32_0 : i32, i32
  }
  func.func @transform_4(%arg0: i32) -> (i32, i32) {
    %c0_i32 = arith.constant 0 : i32
    %c0_i32_0 = arith.constant 0 : i32
    %c0_i32_1 = arith.constant 0 : i32
    return %c0_i32, %c0_i32_0 : i32, i32
  }
  func.func @transform_5(%arg0: i32) -> (i32, i32) {
    %c0_i32 = arith.constant 0 : i32
    %c0_i32_0 = arith.constant 0 : i32
    return %arg0, %c0_i32 : i32, i32
  }
}

</mosaic_0001>

<bundles_post_ra>
// kernel: fc_model.1
= control target key start
LH: loop header
LB: loop body
LE: loop exit
PB: predicated region body
PF: predicated region fallthrough
CT: control target
= control target key end

     0   :  { %s4179_s18 = smov 0   ;;  %s5257_s0 = inlined_call_operand.vmem [shape: f32[250,32], index: 0, kind: input, shape index: {}]   ;;  %s5258_s1 = inlined_call_operand.vmem [shape: f32[32,128], index: 1, kind: input, shape index: {}]   ;;  %s5259_s2 = inlined_call_operand.vmem [shape: f32[1,128], index: 2, kind: input, shape index: {}]   ;;  %s5260_s3 = inlined_call_operand.vmem [shape: f32[128,16], index: 3, kind: input, shape index: {}]   ;;  %s5261_s4 = inlined_call_operand.vmem [shape: f32[1,16], index: 4, kind: input, shape index: {}]   ;;  %s5262_s5 = inlined_call_operand.vmem [shape: f32[250,16], index: 5, kind: output, shape index: {}]  }
   0x1 LB: > { %s2832_s19 = sadd.s32 4294967295, %s4147_s18   ;;  %p2836_p0 = scmp.ge.s32.totalorder %s4147_s18, 1  ;;  %s4147_s18 = sphi %s4179_s18, %s15_s18  }
   0x2   : > { %p188_p1 = scmp.lt.s32.totalorder %s4147_s18, 3 }
   0x4   : > { %p189_p2 = pnand %p2836_p0, %p188_p1 }
   0x6   : > { %192 = sbr.rel (%p189_p2) target bundleno = 814 (0x32e), region = 40 }
   0xd   : > { %v244_v0 = vld [vmem:[%s5258_s1] sm:$0xff]  ;;  %v245_v1 = vld [vmem:[%s5258_s1 + $0x8] sm:$0xff]  ;;  %v246_v2 = vld [vmem:[%s5258_s1 + $0x10] sm:$0xff]  ;;  %s2837_s26 = sshll.u32 %s2832_s19, 4  ;;  %vm255_vm0 = vcmask 261120   ;;  %vm2759_vm1 = vcmask 130048  }
   0xe   : > { %v305_v3 = vand.u32 4294901760, %v244_v0  ;;  %v308_v4 = vand.u32 4294901760, %v245_v1  ;;  %v247_v5 = vld [vmem:[%s5258_s1 + $0x18] sm:$0xff]  ;;  %v311_v6 = vand.u32 4294901760, %v246_v2  ;;  %p217_p3 = scmp.lt.s32.totalorder %s2837_s26, 31 }
   0xf   : > { %v314_v7 = vand.u32 4294901760, %v247_v5 }
  0x10   : > { %v4199_v8 = vpack.c.bf16 %v308_v4, %v305_v3  ;;  %s5394_s26 = smov (!%p217_p3, %s2837_s26), 31  ;;  %v4203_v9 = vsub.f32 %v244_v0, %v305_v3  ;;  %v4205_v10 = vsub.f32 %v245_v1, %v308_v4  ;;  %v4207_v11 = vsub.f32 %v246_v2, %v311_v6 }
  0x11   : > { %v4209_v12 = vpack.c.bf16 %v314_v7, %v311_v6  ;;  %v4211_v13 = vsub.f32 %v247_v5, %v314_v7  ;;  %s2838_s29 = sshll.u32 %s5394_s26, 3 }
  0x12   : > { %3686 = vmatprep.subr.bf16.mxu0 %v4199_v8  ;;  %v536_v14 = vand.u32 4294901760, %v4203_v9  ;;  %v543_v15 = vand.u32 4294901760, %v4205_v10  ;;  %v550_v16 = vand.u32 4294901760, %v4207_v11  ;;  %s4224_s7 = scalar_lea.vmem %s5257_s0, %s2838_s29  ;;  %s5220_s25 = scalar_lea.vmem %s5262_s5, %s2838_s29 }
  0x13   : > { %3688 = vmatpush3.bf16.msra.mxu0 %v4199_v8  ;;  %v557_v17 = vand.u32 4294901760, %v4211_v13  ;;  %v228_v18 = vld [vmem:[%s4224_s7] sm:$0xff]  ;;  %v229_v21 = vld [vmem:[%s4224_s7 + $0x8] sm:$0xff]  ;;  %v230_v22 = vld [vmem:[%s4224_s7 + $0x10] sm:$0xff] }
  0x14   : > { %3690 = vmatprep.subr.bf16.mxu0 %v4209_v12  ;;  %v537_v19 = vsub.f32 %v4203_v9, %v536_v14  ;;  %v544_v20 = vsub.f32 %v4205_v10, %v543_v15  ;;  %v4236_v23 = vsub.f32 %v4207_v11, %v550_v16  ;;  %v4238_v24 = vpack.c.bf16 %v543_v15, %v536_v14  ;;  %v231_v28 = vld [vmem:[%s4224_s7 + $0x18] sm:$0xff]  ;;  %v232_v29 = vld [vmem:[%s4224_s7 + $0x20] sm:$0xff]  ;;  %v233_v30 = vld [vmem:[%s4224_s7 + $0x28] sm:$0xff] }
  0x15   : > { %v257_v25 = vsel %vm255_vm0, %v228_v18, 0  ;;  %v260_v26 = vsel %vm255_vm0, %v229_v21, 0  ;;  %v263_v27 = vsel %vm255_vm0, %v230_v22, 0  ;;  %v4249_v31 = vsub.f32 %v4211_v13, %v557_v17  ;;  %v234_v36 = vld [vmem:[%s4224_s7 + $0x30] sm:$0xff]  ;;  %v235_v45 = vld [vmem:[%s4224_s7 + $0x38] sm:$0xff]  ;;  %v236_v2 = vld [vmem:[%s4224_s7 + $0x40] sm:$0xff] }
  0x16   : > { %v4251_v32 = vand.u32 4294901760, %v257_v25  ;;  %v538_v33 = vand.u32 4294901760, %v537_v19  ;;  %v545_v34 = vand.u32 4294901760, %v544_v20  ;;  %v4253_v35 = vand.u32 4294901760, %v260_v26  ;;  %v237_v19 = vld [vmem:[%s4224_s7 + $0x48] sm:$0xff]  ;;  %v238_v20 = vld [vmem:[%s4224_s7 + $0x50] sm:$0xff] }
  0x17   : > { %3692 = vmatpush3.bf16.msra.mxu0 %v4209_v12  ;;  %v4257_v37 = vand.u32 4294901760, %v263_v27  ;;  %v266_v38 = vsel %vm255_vm0, %v231_v28, 0  ;;  %v269_v39 = vsel %vm255_vm0, %v232_v29, 0  ;;  %v272_v40 = vsel %vm255_vm0, %v233_v30, 0 }
  0x18   : > { %v4263_v41 = vsub.f32 %v257_v25, %v4251_v32  ;;  %v3693_v42 = vpack.c.bf16 %v545_v34, %v538_v33  ;;  %v4266_v43 = vsub.f32 %v260_v26, %v4253_v35  ;;  %v4268_v44 = vand.u32 4294901760, %v266_v38  ;;  %v239_v33 = vld [vmem:[%s4224_s7 + $0x58] sm:$0xff]  ;;  %v240_v34 = vld [vmem:[%s4224_s7 + $0x60] sm:$0xff] }
  0x19   : > { %v4272_v46 = vsub.f32 %v263_v27, %v4257_v37  ;;  %v4274_v47 = vand.u32 4294901760, %v269_v39  ;;  %v4276_v48 = vand.u32 4294901760, %v272_v40  ;;  %v275_v49 = vsel %vm255_vm0, %v234_v36, 0  ;;  %v241_v36 = vld [vmem:[%s4224_s7 + $0x68] sm:$0xff] }
  0x1a   : > { %v375_v50 = vand.u32 4294901760, %v4263_v41  ;;  %3694 = vmatprep.subr.bf16.mxu0 %v3693_v42  ;;  %v385_v51 = vand.u32 4294901760, %v4266_v43  ;;  %v4282_v52 = vsub.f32 %v266_v38, %v4268_v44  ;;  %v4284_v53 = vand.u32 4294901760, %v275_v49 }
  0x1b   : > { %v395_v54 = vand.u32 4294901760, %v4272_v46  ;;  %v4288_v55 = vsub.f32 %v269_v39, %v4274_v47  ;;  %v4291_v56 = vsub.f32 %v272_v40, %v4276_v48  ;;  %v278_v57 = vsel %vm255_vm0, %v235_v45, 0 }
  0x1c   : > { %v376_v58 = vsub.f32 %v4263_v41, %v375_v50  ;;  %v386_v59 = vsub.f32 %v4266_v43, %v385_v51  ;;  %v405_v60 = vand.u32 4294901760, %v4282_v52  ;;  %v4302_v61 = vsub.f32 %v275_v49, %v4284_v53 }
  0x1d   : > { %v396_v62 = vsub.f32 %v4272_v46, %v395_v54  ;;  %v415_v63 = vand.u32 4294901760, %v4288_v55  ;;  %v425_v0 = vand.u32 4294901760, %v4291_v56  ;;  %v4309_v1 = vand.u32 4294901760, %v278_v57 }
  0x1e   : > { %v377_v3 = vand.u32 4294901760, %v376_v58  ;;  %v387_v4 = vand.u32 4294901760, %v386_v59  ;;  %v406_v5 = vsub.f32 %v4282_v52, %v405_v60  ;;  %v5280_v6 = vand.u32 4294901760, %v4302_v61 }
  0x1f   : > { %v397_v7 = vand.u32 4294901760, %v396_v62  ;;  %v416_v14 = vsub.f32 %v4288_v55, %v415_v63  ;;  %v426_v15 = vsub.f32 %v4291_v56, %v425_v0  ;;  %v4323_v18 = vsub.f32 %v278_v57, %v4309_v1 }
  0x20   : > { %3165 = vmatprep.mubr.f32.mxu0 %v377_v3  ;;  %v407_v21 = vand.u32 4294901760, %v406_v5  ;;  %v281_v22 = vsel %vm255_vm0, %v236_v2, 0  ;;  %v552_v25 = vand.u32 4294901760, %v4236_v23  ;;  %v4331_v26 = vpack.c.bf16 %v4205_v10, %v4203_v9  ;;  %v243_v5 = vld [vmem:[%s4224_s7 + $0x78] sm:$0xff] }
  0x21   : > { %3166 = vmatmul.mubr.f32.vlgmr.msra.gmra.mrb[0].mxu0 %v387_v4  ;;  %v417_v27 = vand.u32 4294901760, %v416_v14  ;;  %v436_v28 = vsub.f32 %v4302_v61, %v5280_v6  ;;  %v5279_v29 = vand.u32 4294901760, %v4323_v18  ;;  %v4337_v30 = vand.u32 4294901760, %v281_v22 }
  0x22   : > { %3696 = vmatpush3.bf16.msra.mxu0 %v3693_v42  ;;  %3168 = vmatprep.mubr.f32.mxu0 %v397_v7  ;;  %v427_v23 = vand.u32 4294901760, %v426_v15  ;;  %v559_v9 = vand.u32 4294901760, %v4249_v31  ;;  %v284_v10 = vsel %vm255_vm0, %v237_v19, 0  ;;  %v287_v38 = vsel %vm255_vm0, %v238_v20, 0  ;;  %v242_v42 = vld [vmem:[%s4224_s7 + $0x70] sm:$0xff] }
  0x23   : > { %v446_v39 = vsub.f32 %v4323_v18, %v5279_v29  ;;  %v4349_v40 = vsub.f32 %v281_v22, %v4337_v30  ;;  %v4351_v45 = vand.u32 4294901760, %v284_v10  ;;  %v4353_v49 = vand.u32 4294901760, %v287_v38 }
  0x24   : > { %v3697_v57 = vpack.c.bf16 %v559_v9, %v552_v25  ;;  %v290_v31 = vsel %vm255_vm0, %v239_v33, 0  ;;  %v293_v58 = vsel %vm255_vm0, %v240_v34, 0  ;;  %v296_v59 = vsel %vm255_vm0, %v241_v36, 0 }
  0x25   : > { %3169 = vmatmul.mubr.f32.gmra.mrb[2].mxu0 %v407_v21  ;;  %v437_v62 = vand.u32 4294901760, %v436_v28  ;;  %v5276_v2 = vand.u32 4294901760, %v4349_v40  ;;  %v4361_v3 = vsub.f32 %v284_v10, %v4351_v45  ;;  %v4364_v4 = vsub.f32 %v287_v38, %v4353_v49 }
  0x26   : > { %3171 = vmatprep.mubr.f32.mxu0 %v417_v27  ;;  %3698 = vmatprep.subr.bf16.mxu0 %v3697_v57  ;;  %v4367_v7 = vand.u32 4294901760, %v290_v31  ;;  %v4369_v14 = vand.u32 4294901760, %v293_v58  ;;  %v4371_v15 = vand.u32 4294901760, %v296_v59  ;;  %v299_v19 = vsel %vm255_vm0, %v242_v42, 0 }
  0x27   : > { %v456_v20 = vsub.f32 %v4349_v40, %v5276_v2  ;;  %v5275_v21 = vand.u32 4294901760, %v4361_v3  ;;  %3700 = vmatpush3.bf16.msra.mxu0 %v3697_v57  ;;  %v5274_v22 = vand.u32 4294901760, %v4364_v4  ;;  %v4379_v25 = vand.u32 4294901760, %v299_v19  ;;  %v4561_v2 = vld [vmem:[%s5260_s3 + $0x58] sm:$0xff] }
  0x28   : > { %v447_v27 = vand.u32 4294901760, %v446_v39  ;;  %v4382_v28 = vsub.f32 %v290_v31, %v4367_v7  ;;  %v4385_v33 = vsub.f32 %v293_v58, %v4369_v14  ;;  %v302_v34 = vsel %vm255_vm0, %v243_v5, 0  ;;  %3702 = vmatprep.subr.bf16.mxu0 %v4331_v26 }
  0x29   : > { %3172 = vmatmul.mubr.f32.gmra.mrb[4].mxu0 %v427_v23  ;;  %v457_v36 = vand.u32 4294901760, %v456_v20  ;;  %v466_v9 = vsub.f32 %v4361_v3, %v5275_v21  ;;  %v476_v10 = vsub.f32 %v4364_v4, %v5274_v22  ;;  %v4396_v38 = vsub.f32 %v296_v59, %v4371_v15  ;;  %v4556_v21 = vld [vmem:[%s5260_s3 + $0x50] sm:$0xff] }
  0x2a   : > { %3174 = vmatprep.mubr.f32.mxu0 %v437_v62  ;;  %v5263_v39 = vand.u32 4294901760, %v4382_v28  ;;  %v5271_v42 = vand.u32 4294901760, %v4385_v33  ;;  %v4401_v57 = vsub.f32 %v299_v19, %v4379_v25  ;;  %v4403_v23 = vand.u32 4294901760, %v302_v34 }
  0x2b   : > { %v4409_v31 = vpack.c.bf16 %v557_v17, %v550_v16  ;;  %v467_v58 = vand.u32 4294901760, %v466_v9  ;;  %v5270_v62 = vand.u32 4294901760, %v4396_v38  ;;  %v477_v19 = vand.u32 4294901760, %v476_v10 }
  0x2c   : > { %v486_v59 = vsub.f32 %v4382_v28, %v5263_v39  ;;  %v4416_v5 = vsub.f32 %v302_v34, %v4403_v23  ;;  %v496_v20 = vsub.f32 %v4385_v33, %v5271_v42  ;;  %v5269_v16 = vand.u32 4294901760, %v4401_v57  ;;  %v4539_v42 = vld [vmem:[%s5260_s3 + $0x48] sm:$0xff] }
  0x2d   : > { %3175 = vmatmul.mubr.f32.gmra.mrb[6].mxu0 %v447_v27  ;;  %v506_v27 = vsub.f32 %v4396_v38, %v5270_v62  ;;  %v4534_v62 = vld [vmem:[%s5260_s3 + $0x40] sm:$0xff]  ;;  %v1501_v22 = vand.u32 4294901760, %v4539_v42  ;;  %v1507_v29 = vand.u32 4294901760, %v4561_v2 }
  0x2e   : > { %3177 = vmatprep.mubr.f32.mxu0 %v457_v36  ;;  %v487_v17 = vand.u32 4294901760, %v486_v59  ;;  %v5264_v9 = vand.u32 4294901760, %v4416_v5  ;;  %v497_v39 = vand.u32 4294901760, %v496_v20  ;;  %v516_v34 = vsub.f32 %v4401_v57, %v5269_v16 }
  0x2f   : > { %v507_v36 = vand.u32 4294901760, %v506_v27 }
  0x30   : > { %v526_v10 = vsub.f32 %v4416_v5, %v5264_v9 }
  0x31   : > { %3178 = vmatmul.mubr.f32.gmra.mrb[8].mxu0 %v467_v58  ;;  %v517_v58 = vand.u32 4294901760, %v516_v34 }
  0x32   : > { %3180 = vmatprep.mubr.f32.mxu0 %v477_v19  ;;  %v527_v59 = vand.u32 4294901760, %v526_v10  ;;  %v3705_v19 = vpack.c.bf16 %v4211_v13, %v4207_v11  ;;  %v4455_v11 = vld [vmem:[%s5260_s3] sm:$0xff]  ;;  %v4460_v13 = vld [vmem:[%s5260_s3 + $0x8] sm:$0xff] }
  0x33   : > { %v5265_v20 = vand.u32 4294901760, %v4460_v13  ;;  %v4485_v10 = vld [vmem:[%s5260_s3 + $0x28] sm:$0xff] }
  0x34   : > { %v5272_v9 = vand.u32 4294901760, %v4485_v10 }
  0x35   : > { %3181 = vmatmul.mubr.f32.gmra.mrb[10].mxu0 %v487_v17  ;;  %v4473_v17 = vld [vmem:[%s5260_s3 + $0x18] sm:$0xff] }
  0x36   : > { %3183 = vmatprep.mubr.f32.mxu0 %v497_v39  ;;  %v5266_v39 = vand.u32 4294901760, %v4455_v11  ;;  %v5267_v34 = vand.u32 4294901760, %v4473_v17 }
  0x39   : > { %3184 = vmatmul.mubr.f32.gmra.mrb[12].mxu0 %v507_v36  ;;  %v4480_v36 = vld [vmem:[%s5260_s3 + $0x20] sm:$0xff] }
  0x3a   : > { %3186 = vmatprep.mubr.f32.mxu0 %v517_v58  ;;  %v4492_v58 = vpack.c.bf16 %v5265_v20, %v5266_v39  ;;  %v4510_v20 = vld [vmem:[%s5260_s3 + $0x30] sm:$0xff]  ;;  %v4515_v39 = vld [vmem:[%s5260_s3 + $0x38] sm:$0xff] }
  0x3b   : > { %v5277_v16 = vand.u32 4294901760, %v4515_v39 }
  0x3c   : > { %3734 = vmatprep.subr.bf16.mxu1 %v4492_v58 }
  0x3d   : > { %3187 = vmatmul.mubr.f32.gmra.mrb[14].mxu0 %v527_v59  ;;  %3736 = vmatpush3.bf16.msra.mxu1 %v4492_v58 }
  0x3e   : > { %3197 = vmatprep.mubr.f32.mxu0 %v4251_v32 }
  0x41   : > { %3198 = vmatmul.mubr.f32.vlgmr.msra.gmra.mrb[0].mxu0 %v4253_v35 }
  0x42   : > { %3704 = vmatpush3.bf16.msra.mxu0 %v4331_v26  ;;  %3200 = vmatprep.mubr.f32.mxu0 %v4257_v37  ;;  %v4465_v26 = vld [vmem:[%s5260_s3 + $0x10] sm:$0xff] }
  0x43   : > { %3706 = vmatprep.subr.bf16.mxu0 %v3705_v19  ;;  %v5268_v27 = vand.u32 4294901760, %v4465_v26 }
  0x45   : > { %3201 = vmatmul.mubr.f32.gmra.mrb[2].mxu0 %v4268_v44  ;;  %v4501_v59 = vpack.c.bf16 %v5267_v34, %v5268_v27  ;;  %v5278_v27 = vand.u32 4294901760, %v4510_v20 }
  0x46   : > { %3203 = vmatprep.mubr.f32.mxu0 %v4274_v47  ;;  %3708 = vmatpush3.bf16.msra.mxu0 %v3705_v19  ;;  %v5273_v19 = vand.u32 4294901760, %v4480_v36 }
  0x47   : > { %3710 = vmatprep.subr.bf16.mxu0 %v4199_v8  ;;  %3738 = vmatprep.subr.bf16.mxu1 %v4501_v59 }
  0x48   : > { %v4526_v34 = vpack.c.bf16 %v5272_v9, %v5273_v19  ;;  %3740 = vmatpush3.bf16.msra.mxu1 %v4501_v59  ;;  %v4548_v9 = vpack.c.bf16 %v5277_v16, %v5278_v27  ;;  %v1498_v19 = vand.u32 4294901760, %v4534_v62  ;;  %v1504_v27 = vand.u32 4294901760, %v4556_v21 }
  0x49   : > { %3204 = vmatmul.mubr.f32.gmra.mrb[4].mxu0 %v4276_v48 }
  0x4a   : > { %3206 = vmatprep.mubr.f32.mxu0 %v4284_v53  ;;  %3742 = vmatprep.subr.bf16.mxu1 %v4526_v34  ;;  %v4570_v16 = vpack.c.bf16 %v1501_v22, %v1498_v19  ;;  %v4582_v6 = vpack.c.bf16 %v1507_v29, %v1504_v27 }
  0x4c   : > { %3744 = vmatpush3.bf16.msra.mxu1 %v4526_v34  ;;  %5323 = vst [vmem:[#allocation2_spill] sm:$0xff] %v4570_v16  ;;  %5324 = vst [vmem:[#allocation3_spill] sm:$0xff] %v4582_v6 }
  0x4d   : > { %3207 = vmatmul.mubr.f32.gmra.mrb[6].mxu0 %v4309_v1  ;;  %3746 = vmatprep.subr.bf16.mxu1 %v4548_v9 }
  0x4e   : > { %3209 = vmatprep.mubr.f32.mxu0 %v4337_v30 }
  0x50   : > { %3748 = vmatpush3.bf16.msra.mxu1 %v4548_v9 }
  0x51   : > { %3210 = vmatmul.mubr.f32.gmra.mrb[8].mxu0 %v4351_v45  ;;  %3750 = vmatprep.subr.bf16.mxu1 %v4570_v16 }
  0x52   : > { %3212 = vmatprep.mubr.f32.mxu0 %v4353_v49 }
  0x54   : > { %3752 = vmatpush3.bf16.msra.mxu1 %v4570_v16 }
  0x55   : > { %3213 = vmatmul.mubr.f32.gmra.mrb[10].mxu0 %v4367_v7  ;;  %3754 = vmatprep.subr.bf16.mxu1 %v4582_v6 }
  0x56   : > { %3215 = vmatprep.mubr.f32.mxu0 %v4369_v14 }
  0x58   : > { %3756 = vmatpush3.bf16.msra.mxu1 %v4582_v6 }
  0x59   : > { %3216 = vmatmul.mubr.f32.gmra.mrb[12].mxu0 %v4371_v15 }
  0x5a   : > { %3218 = vmatprep.mubr.f32.mxu0 %v4379_v25 }
  0x5d   : > { %3219 = vmatmul.mubr.f32.gmra.mrb[14].mxu0 %v4403_v23 }
  0x5e   : > { %3229 = vmatprep.mubr.f32.mxu0 %v4263_v41  ;;  %v5326_v41 = vand.u32 4294901760, %v4323_v18 }
  0x61   : > { %3230 = vmatmul.mubr.f32.vlgmr.msra.gmra.mrb[0].mxu0 %v4266_v43  ;;  %v5327_v43 = vand.u32 4294901760, %v4349_v40 }
  0x62   : > { %3712 = vmatpush3.bf16.msra.mxu0 %v4199_v8  ;;  %3232 = vmatprep.mubr.f32.mxu0 %v4272_v46  ;;  %v5328_v46 = vand.u32 4294901760, %v4361_v3 }
  0x63   : > { %3714 = vmatprep.subr.bf16.mxu0 %v4209_v12 }
  0x65   : > { %3233 = vmatmul.mubr.f32.gmra.mrb[2].mxu0 %v4282_v52  ;;  %v5331_v52 = vand.u32 4294901760, %v4385_v33 }
  0x66   : > { %3235 = vmatprep.mubr.f32.mxu0 %v4288_v55  ;;  %3716 = vmatpush3.bf16.msra.mxu0 %v4209_v12  ;;  %v5333_v55 = vand.u32 4294901760, %v4401_v57 }
  0x67   : > { %3718 = vmatprep.subr.bf16.mxu0 %v4238_v24 }
  0x69   : > { %3236 = vmatmul.mubr.f32.gmra.mrb[4].mxu0 %v4291_v56  ;;  %v5334_v56 = vand.u32 4294901760, %v4416_v5 }
  0x6a   : > { %3238 = vmatprep.mubr.f32.mxu0 %v4302_v61 }
  0x6d   : > { %3239 = vmatmul.mubr.f32.gmra.mrb[6].mxu0 %v4323_v18 }
  0x6e   : > { %3241 = vmatprep.mubr.f32.mxu0 %v4349_v40 }
  0x71   : > { %3242 = vmatmul.mubr.f32.gmra.mrb[8].mxu0 %v4361_v3 }
  0x72   : > { %3244 = vmatprep.mubr.f32.mxu0 %v4364_v4 }
  0x75   : > { %3245 = vmatmul.mubr.f32.gmra.mrb[10].mxu0 %v4382_v28 }
  0x76   : > { %3247 = vmatprep.mubr.f32.mxu0 %v4385_v33 }
  0x79   : > { %3248 = vmatmul.mubr.f32.gmra.mrb[12].mxu0 %v4396_v38 }
  0x7a   : > { %3250 = vmatprep.mubr.f32.mxu0 %v4401_v57 }
  0x7d   : > { %3251 = vmatmul.mubr.f32.gmra.mrb[14].mxu0 %v4416_v5 }
  0x7e   : > { %3261 = vmatprep.mubr.f32.mxu0 %v375_v50  ;;  %v5329_v50 = vand.u32 4294901760, %v4364_v4 }
  0x81   : > { %3262 = vmatmul.mubr.f32.vlgmr.msra.gmra.mrb[0].mxu0 %v385_v51  ;;  %v5330_v51 = vand.u32 4294901760, %v4382_v28 }
  0x82   : > { %3720 = vmatpush3.bf16.msra.mxu0 %v4238_v24  ;;  %3264 = vmatprep.mubr.f32.mxu0 %v395_v54  ;;  %v5325_v24 = vand.u32 4294901760, %v4302_v61  ;;  %v5332_v54 = vand.u32 4294901760, %v4396_v38  ;;  %v5337_v61 = vand.u32 4294901760, %v4455_v11 }
  0x83   : > { %3722 = vmatprep.subr.bf16.mxu0 %v4409_v31 }
  0x85   : > { %3265 = vmatmul.mubr.f32.gmra.mrb[2].mxu0 %v405_v60 }
  0x86   : > { %3267 = vmatprep.mubr.f32.mxu0 %v415_v63  ;;  %3724 = vmatpush3.bf16.msra.mxu0 %v4409_v31  ;;  %v4702_v63 = vsub.f32 %v4455_v11, %v5337_v61 }
  0x87   : > { %3726 = vmatprep.subr.bf16.mxu0 %v4199_v8 }
  0x88   : > { %5338 = vst [vmem:[#allocation6_spill] sm:$0xff] %v4702_v63  ;;  %v5296_v18 = vand.u32 4294901760, %v4702_v63 }
  0x89   : > { %3268 = vmatmul.mubr.f32.gmra.mrb[4].mxu0 %v425_v0  ;;  %v5339_v0 = vand.u32 4294901760, %v4460_v13 }
  0x8a   : > { %3270 = vmatprep.mubr.f32.mxu0 %v5325_v24  ;;  %v1718_v40 = vsub.f32 %v4702_v63, %v5296_v18 }
  0x8d   : > { %3271 = vmatmul.mubr.f32.gmra.mrb[6].mxu0 %v5326_v41 }
  0x8e   : > { %3273 = vmatprep.mubr.f32.mxu0 %v5327_v43 }
  0x91   : > { %3274 = vmatmul.mubr.f32.gmra.mrb[8].mxu0 %v5328_v46 }
  0x92   : > { %3276 = vmatprep.mubr.f32.mxu0 %v5329_v50 }
  0x95   : > { %3277 = vmatmul.mubr.f32.gmra.mrb[10].mxu0 %v5330_v51 }
  0x96   : > { %3279 = vmatprep.mubr.f32.mxu0 %v5331_v52 }
  0x99   : > { %3280 = vmatmul.mubr.f32.gmra.mrb[12].mxu0 %v5332_v54 }
  0x9a   : > { %3282 = vmatprep.mubr.f32.mxu0 %v5333_v55  ;;  %v5345_v55 = vand.u32 4294901760, %v4465_v26 }
  0x9d   : > { %3283 = vmatmul.mubr.f32.gmra.mrb[14].mxu0 %v5334_v56  ;;  %v4763_v56 = vsub.f32 %v4465_v26, %v5345_v55 }
  0x9e   : > { %3293 = vmatprep.mubr.f32.mxu0 %v4251_v32 }
  0x9f   : > { %v5293_v61 = vand.u32 4294901760, %v4763_v56 }
  0xa1   : > { %3294 = vmatmul.mubr.f32.vlgmr.msra.gmra.mrb[0].mxu0 %v4253_v35 }
  0xa2   : > { %3728 = vmatpush3.bf16.msra.mxu0 %v4199_v8  ;;  %3296 = vmatprep.mubr.f32.mxu0 %v4257_v37  ;;  %v1462_v8 = vld [vmem:[%s5260_s3 + $0x60] sm:$0xff] }
  0xa3   : > { %3730 = vmatprep.subr.bf16.mxu0 %v4209_v12 }
  0xa5   : > { %3297 = vmatmul.mubr.f32.gmra.mrb[2].mxu0 %v4268_v44 }
  0xa6   : > { %3299 = vmatprep.mubr.f32.mxu0 %v4274_v47  ;;  %3732 = vmatpush3.bf16.msra.mxu0 %v4209_v12  ;;  %v1463_v12 = vld [vmem:[%s5260_s3 + $0x68] sm:$0xff] }
  0xa7   : > { %3894 = vmatprep.subr.bf16.mxu0 %v4492_v58 }
  0xa9   : > { %3300 = vmatmul.mubr.f32.gmra.mrb[4].mxu0 %v4276_v48 }
  0xaa   : > { %3302 = vmatprep.mubr.f32.mxu0 %v4284_v53 }
  0xad   : > { %3303 = vmatmul.mubr.f32.gmra.mrb[6].mxu0 %v4309_v1 }
  0xae   : > { %3305 = vmatprep.mubr.f32.mxu0 %v4337_v30 }
  0xb1   : > { %3306 = vmatmul.mubr.f32.gmra.mrb[8].mxu0 %v4351_v45 }
  0xb2   : > { %3308 = vmatprep.mubr.f32.mxu0 %v4353_v49 }
  0xb5   : > { %3309 = vmatmul.mubr.f32.gmra.mrb[10].mxu0 %v4367_v7 }
  0xb6   : > { %3311 = vmatprep.mubr.f32.mxu0 %v4369_v14 }
  0xb9   : > { %3312 = vmatmul.mubr.f32.gmra.mrb[12].mxu0 %v4371_v15 }
  0xba   : > { %3314 = vmatprep.mubr.f32.mxu0 %v4379_v25 }
  0xbd   : > { %3315 = vmatmul.mubr.f32.gmra.mrb[14].mxu0 %v4403_v23 }
  0xbe   : > { %3325 = vmatprep.mubr.f32.mxu0 %v4251_v32  ;;  %v1510_v32 = vand.u32 4294901760, %v1462_v8 }
  0xc1   : > { %3326 = vmatmul.mubr.f32.vlgmr.msra.gmra.mrb[0].mxu0 %v4253_v35  ;;  %v1513_v35 = vand.u32 4294901760, %v1463_v12 }
  0xc2   : > { %3328 = vmatprep.mubr.f32.mxu0 %v4257_v37  ;;  %3896 = vmatpush3.bf16.msra.mxu0 %v4492_v58 }
  0xc3   : > { %3898 = vmatprep.subr.bf16.mxu0 %v4501_v59  ;;  %v4681_v37 = vpack.c.bf16 %v1513_v35, %v1510_v32 }
  0xc5   : > { %3329 = vmatmul.mubr.f32.gmra.mrb[2].mxu0 %v4268_v44  ;;  %5335 = vst [vmem:[#allocation4_spill] sm:$0xff] %v4681_v37  ;;  %v1464_v44 = vld [vmem:[%s5260_s3 + $0x70] sm:$0xff]  ;;  %3758 = vmatprep.subr.bf16.mxu1 %v4681_v37 }
  0xc6   : > { %3331 = vmatprep.mubr.f32.mxu0 %v4274_v47  ;;  %3900 = vmatpush3.bf16.msra.mxu0 %v4501_v59  ;;  %v1465_v47 = vld [vmem:[%s5260_s3 + $0x78] sm:$0xff] }
  0xc7   : > { %3902 = vmatprep.subr.bf16.mxu0 %v4526_v34  ;;  %3760 = vmatpush3.bf16.msra.mxu1 %v4681_v37 }
  0xc9   : > { %3332 = vmatmul.mubr.f32.gmra.mrb[4].mxu0 %v4276_v48  ;;  %v1516_v48 = vand.u32 4294901760, %v1464_v44 }
  0xca   : > { %3334 = vmatprep.mubr.f32.mxu0 %v4284_v53  ;;  %3904 = vmatpush3.bf16.msra.mxu0 %v4526_v34  ;;  %v1519_v53 = vand.u32 4294901760, %v1465_v47 }
  0xcb   : > { %3906 = vmatprep.subr.bf16.mxu0 %v4548_v9  ;;  %v4732_v38 = vsub.f32 %v1464_v44, %v1516_v48  ;;  %v5348_v44 = vand.u32 4294901760, %v4485_v10 }
  0xcc   : > { %v4693_v60 = vpack.c.bf16 %v1519_v53, %v1516_v48  ;;  %v4734_v57 = vsub.f32 %v1465_v47, %v1519_v53  ;;  %v5349_v48 = vand.u32 4294901760, %v4510_v20  ;;  %v5350_v53 = vand.u32 4294901760, %v4515_v39 }
  0xcd   : > { %3335 = vmatmul.mubr.f32.gmra.mrb[6].mxu0 %v4309_v1  ;;  %v4707_v1 = vsub.f32 %v4460_v13, %v5339_v0  ;;  %5343 = vst [vmem:[#allocation10_spill] sm:$0xff] %v4732_v38  ;;  %v5282_v5 = vand.u32 4294901760, %v4732_v38  ;;  %v4778_v47 = vsub.f32 %v4485_v10, %v5348_v44 }
  0xce   : > { %3337 = vmatprep.mubr.f32.mxu0 %v4337_v30  ;;  %3908 = vmatpush3.bf16.msra.mxu0 %v4548_v9  ;;  %5336 = vst [vmem:[#allocation5_spill] sm:$0xff] %v4693_v60  ;;  %5344 = vst [vmem:[#allocation11_spill] sm:$0xff] %v4734_v57  ;;  %v5281_v11 = vand.u32 4294901760, %v4734_v57  ;;  %v4758_v54 = vpack.c.bf16 %v4734_v57, %v4732_v38  ;;  %v4783_v26 = vsub.f32 %v4510_v20, %v5349_v48  ;;  %v4799_v20 = vld [vmem:[%s5259_s2] ss:$0 sm:$0xff] }
  0xcf   : > { %3910 = vmatprep.subr.bf16.mxu0 %v4570_v16  ;;  %3762 = vmatprep.subr.bf16.mxu1 %v4693_v60  ;;  %5340 = vst [vmem:[#allocation7_spill] sm:$0xff] %v4707_v1  ;;  %v5295_v30 = vand.u32 4294901760, %v4707_v1  ;;  %v1816_v24 = vsub.f32 %v4732_v38, %v5282_v5  ;;  %v4750_v51 = vpack.c.bf16 %v4707_v1, %v4702_v63 }
  0xd0   : > { %3764 = vmatpush3.bf16.msra.mxu1 %v4693_v60  ;;  %v1823_v41 = vsub.f32 %v4734_v57, %v5281_v11  ;;  %v5288_v10 = vand.u32 4294901760, %v4783_v26 }
  0xd1   : > { %3338 = vmatmul.mubr.f32.gmra.mrb[8].mxu0 %v4351_v45  ;;  %v1725_v45 = vsub.f32 %v4707_v1, %v5295_v30  ;;  %v1817_v43 = vand.u32 4294901760, %v1816_v24 }
  0xd2   : > { %3340 = vmatprep.mubr.f32.mxu0 %v4353_v49  ;;  %3912 = vmatpush3.bf16.msra.mxu0 %v4570_v16  ;;  %v1719_v49 = vand.u32 4294901760, %v1718_v40  ;;  %v1824_v46 = vand.u32 4294901760, %v1823_v41  ;;  %v5289_v40 = vand.u32 4294901760, %v4778_v47  ;;  %v4827_v41 = vsub.f32 %v4539_v42, %v1501_v22 }
  0xd3   : > { %3914 = vmatprep.subr.bf16.mxu0 %v4582_v6  ;;  %v1726_v3 = vand.u32 4294901760, %v1725_v45 }
  0xd4   : > { %v4746_v50 = vpack.c.bf16 %v1824_v46, %v1817_v43 }
  0xd5   : > { %3341 = vmatmul.mubr.f32.gmra.mrb[10].mxu0 %v4367_v7  ;;  %v4717_v4 = vpack.c.bf16 %v1726_v3, %v1719_v49  ;;  %v4720_v7 = vsub.f32 %v1462_v8, %v1510_v32  ;;  %v5346_v8 = vand.u32 4294901760, %v4473_v17  ;;  %v5347_v32 = vand.u32 4294901760, %v4480_v36 }
  0xd6   : > { %3343 = vmatprep.mubr.f32.mxu0 %v4369_v14  ;;  %3916 = vmatpush3.bf16.msra.mxu0 %v4582_v6  ;;  %v4722_v14 = vsub.f32 %v1463_v12, %v1513_v35 }
  0xd7   : > { %3918 = vmatprep.subr.bf16.mxu0 %v4681_v37  ;;  %3766 = vmatprep.subr.bf16.mxu1 %v4717_v4  ;;  %5341 = vst [vmem:[#allocation8_spill] sm:$0xff] %v4720_v7  ;;  %v4768_v12 = vsub.f32 %v4473_v17, %v5346_v8  ;;  %v4773_v35 = vsub.f32 %v4480_v36, %v5347_v32 }
  0xd8   : > { %5342 = vst [vmem:[#allocation9_spill] sm:$0xff] %v4722_v14  ;;  %v4754_v52 = vpack.c.bf16 %v4722_v14, %v4720_v7  ;;  %v4788_v17 = vsub.f32 %v4515_v39, %v5350_v53  ;;  %v1732_v39 = vsub.f32 %v4763_v56, %v5293_v61 }
  0xd9   : > { %3344 = vmatmul.mubr.f32.gmra.mrb[12].mxu0 %v4371_v15  ;;  %v5284_v15 = vand.u32 4294901760, %v4720_v7  ;;  %v5292_v36 = vand.u32 4294901760, %v4768_v12  ;;  %v5290_v0 = vand.u32 4294901760, %v4773_v35 }
  0xda   : > { %3346 = vmatprep.mubr.f32.mxu0 %v4379_v25  ;;  %3920 = vmatpush3.bf16.msra.mxu0 %v4681_v37  ;;  %v5283_v25 = vand.u32 4294901760, %v4722_v14  ;;  %v5285_v45 = vand.u32 4294901760, %v4788_v17 }
  0xdb   : > { %3922 = vmatprep.subr.bf16.mxu0 %v4693_v60  ;;  %v1802_v28 = vsub.f32 %v4720_v7, %v5284_v15  ;;  %v1739_v49 = vsub.f32 %v4768_v12, %v5292_v36  ;;  %v1746_v3 = vsub.f32 %v4773_v35, %v5290_v0  ;;  %v5286_v15 = vand.u32 4294901760, %v4827_v41 }
  0xdc   : > { %v1809_v33 = vsub.f32 %v4722_v14, %v5283_v25  ;;  %v1767_v24 = vsub.f32 %v4788_v17, %v5285_v45 }
  0xdd   : > { %3347 = vmatmul.mubr.f32.gmra.mrb[14].mxu0 %v4403_v23  ;;  %v1803_v23 = vand.u32 4294901760, %v1802_v28  ;;  %v1753_v28 = vsub.f32 %v4778_v47, %v5289_v40  ;;  %v1740_v55 = vand.u32 4294901760, %v1739_v49  ;;  %v1747_v32 = vand.u32 4294901760, %v1746_v3 }
  0xde   : > { %3924 = vmatpush3.bf16.msra.mxu0 %v4693_v60  ;;  %v1810_v31 = vand.u32 4294901760, %v1809_v33  ;;  %v4816_v33 = vsub.f32 %v4534_v62, %v1498_v19  ;;  %v1733_v19 = vand.u32 4294901760, %v1732_v39  ;;  %v1768_v25 = vand.u32 4294901760, %v1767_v24 }
  0xdf   : > { %v1754_v44 = vand.u32 4294901760, %v1753_v28 }
  0xe0   : > { %v4738_v13 = vpack.c.bf16 %v1810_v31, %v1803_v23  ;;  %v1760_v31 = vsub.f32 %v4783_v26, %v5288_v10  ;;  %v5287_v48 = vand.u32 4294901760, %v4816_v33  ;;  %v4839_v49 = vpack.c.bf16 %v1740_v55, %v1733_v19 }
  0xe1   : > { %v1781_v19 = vsub.f32 %v4827_v41, %v5286_v15 }
  0xe2   : > { %v1761_v5 = vand.u32 4294901760, %v1760_v31  ;;  %v1774_v31 = vsub.f32 %v4816_v33, %v5287_v48 }
 0x194   : > { %v3327_v23 = vpop.f32.mrb[0].mxu0 }
 0x195   : > { %v3941_v43 = vadd.f32 %v3327_v23, %v4799_v20  ;;  %v1340_v46 = vpop.f32.mrb[1].mxu0 }
 0x196   : > { %v3942_v62 = vadd.f32 %v4799_v20, %v1340_v46 }
 0x197   : > { %v1435_v8 = vmax.f32 %v3941_v43, 0.0  ;;  %v4844_v43 = vpack.c.bf16 %v1754_v44, %v1747_v32 }
 0x198   : > { %v1434_v53 = vmax.f32 %v3942_v62, 0.0  ;;  %v3330_v11 = vpop.f32.mrb[2].mxu0  ;;  %v4853_v62 = vpack.c.bf16 %v1768_v25, %v1761_v5 }
 0x199   : > { %v4833_v22 = vand.u32 4294901760, %v1435_v8  ;;  %v3943_v42 = vadd.f32 %v3330_v11, %v4799_v20  ;;  %v1352_v23 = vpop.f32.mrb[3].mxu0 }
 0x19a   : > { %v4836_v45 = vand.u32 4294901760, %v1434_v53  ;;  %v3944_v39 = vadd.f32 %v4799_v20, %v1352_v23  ;;  %v4875_v23 = vsub.f32 %v4561_v2, %v1507_v29  ;;  %v1782_v2 = vand.u32 4294901760, %v1781_v19 }
 0x19b   : > { %v4842_v3 = vsub.f32 %v1435_v8, %v4833_v22  ;;  %v1437_v28 = vmax.f32 %v3943_v42, 0.0 }
 0x19c   : > { %v4850_v24 = vsub.f32 %v1434_v53, %v4836_v45  ;;  %v1436_v11 = vmax.f32 %v3944_v39, 0.0  ;;  %v3333_v46 = vpop.f32.mrb[4].mxu0  ;;  %3661 = vmatprep.mubr.f32.mxu0 %v4836_v45  ;;  %v4866_v53 = vsub.f32 %v4556_v21, %v1504_v27  ;;  %v1775_v27 = vand.u32 4294901760, %v1774_v31 }
 0x19d   : > { %v4858_v55 = vand.u32 4294901760, %v1437_v28  ;;  %v3945_v8 = vadd.f32 %v3333_v46, %v4799_v20  ;;  %v1364_v32 = vpop.f32.mrb[5].mxu0  ;;  %3662 = vmatmul.mubr.f32.vlgmr.msra.gmra.mrb[16].mxu0 %v4833_v22  ;;  %v5291_v44 = vand.u32 4294901760, %v4842_v3 }
 0x19e   : > { %v4868_v25 = vand.u32 4294901760, %v1436_v11  ;;  %v3946_v5 = vadd.f32 %v4799_v20, %v1364_v32  ;;  %v5294_v42 = vand.u32 4294901760, %v4850_v24 }
 0x19f   : > { %v4878_v39 = vsub.f32 %v1437_v28, %v4858_v55  ;;  %v1439_v46 = vmax.f32 %v3945_v8, 0.0  ;;  %v1567_v21 = vsub.f32 %v4842_v3, %v5291_v44 }
 0x1a0   : > { %v4884_v15 = vsub.f32 %v1436_v11, %v4868_v25  ;;  %v1438_v32 = vmax.f32 %v3946_v5, 0.0  ;;  %v3336_v48 = vpop.f32.mrb[6].mxu0  ;;  %3664 = vmatprep.mubr.f32.mxu0 %v4868_v25  ;;  %v1557_v29 = vsub.f32 %v4850_v24, %v5294_v42 }
 0x1a1   : > { %v4890_v28 = vand.u32 4294901760, %v1439_v46  ;;  %v3947_v8 = vadd.f32 %v3336_v48, %v4799_v20  ;;  %v1376_v10 = vpop.f32.mrb[7].mxu0  ;;  %3665 = vmatmul.mubr.f32.gmra.mrb[18].mxu0 %v4858_v55  ;;  %v5297_v31 = vand.u32 4294901760, %v4878_v39  ;;  %v1568_v61 = vand.u32 4294901760, %v1567_v21 }
 0x1a2   : > { %v4896_v5 = vand.u32 4294901760, %v1438_v32  ;;  %v3948_v40 = vadd.f32 %v4799_v20, %v1376_v10  ;;  %v1558_v0 = vand.u32 4294901760, %v1557_v29  ;;  %v5298_v44 = vand.u32 4294901760, %v4884_v15 }
 0x1a3   : > { %v4901_v19 = vsub.f32 %v1439_v46, %v4890_v28  ;;  %v1441_v36 = vmax.f32 %v3947_v8, 0.0  ;;  %v1587_v48 = vsub.f32 %v4878_v39, %v5297_v31 }
 0x1a4   : > { %v4907_v42 = vsub.f32 %v1438_v32, %v4896_v5  ;;  %v1440_v30 = vmax.f32 %v3948_v40, 0.0  ;;  %v3339_v18 = vpop.f32.mrb[8].mxu0  ;;  %3381 = vmatprep.mubr.f32.mxu1 %v1558_v0  ;;  %3667 = vmatprep.mubr.f32.mxu0 %v4896_v5  ;;  %v1577_v10 = vsub.f32 %v4884_v15, %v5298_v44  ;;  %v4919_v32 = vpack.c.bf16 %v1782_v2, %v1775_v27 }
 0x1a5   : > { %v4914_v29 = vand.u32 4294901760, %v1441_v36  ;;  %v3949_v21 = vadd.f32 %v3339_v18, %v4799_v20  ;;  %v1388_v8 = vpop.f32.mrb[9].mxu0  ;;  %3382 = vmatmul.mubr.f32.vlgmr.msra.gmra.mrb[0].mxu1 %v1568_v61  ;;  %3668 = vmatmul.mubr.f32.gmra.mrb[20].mxu0 %v4890_v28  ;;  %v5301_v40 = vand.u32 4294901760, %v4901_v19  ;;  %v1588_v61 = vand.u32 4294901760, %v1587_v48 }
 0x1a6   : > { %v4921_v0 = vand.u32 4294901760, %v1440_v30  ;;  %v3950_v31 = vadd.f32 %v4799_v20, %v1388_v8  ;;  %3768 = vmatpush3.bf16.msra.mxu1 %v4717_v4  ;;  %v1578_v44 = vand.u32 4294901760, %v1577_v10  ;;  %v5302_v46 = vand.u32 4294901760, %v4907_v42 }
 0x1a7   : > { %v4927_v11 = vsub.f32 %v1441_v36, %v4914_v29  ;;  %v1443_v18 = vmax.f32 %v3949_v21, 0.0  ;;  %3770 = vmatprep.subr.bf16.mxu1 %v4839_v49  ;;  %v1607_v27 = vsub.f32 %v4901_v19, %v5301_v40  ;;  %v5351_v36 = vand.u32 4294901760, %v4866_v53 }
 0x1a8   : > { %v4934_v2 = vsub.f32 %v1440_v30, %v4921_v0  ;;  %v1442_v8 = vmax.f32 %v3950_v31, 0.0  ;;  %v3342_v57 = vpop.f32.mrb[10].mxu0  ;;  %3384 = vmatprep.mubr.f32.mxu1 %v1578_v44  ;;  %v1597_v4 = vsub.f32 %v4907_v42, %v5302_v46  ;;  %v5352_v31 = vand.u32 4294901760, %v4875_v23 }
 0x1a9   : > { %v1788_v10 = vsub.f32 %v4866_v53, %v5351_v36  ;;  %v4942_v21 = vand.u32 4294901760, %v1443_v18  ;;  %v3951_v48 = vadd.f32 %v3342_v57, %v4799_v20  ;;  %v1400_v38 = vpop.f32.mrb[11].mxu0  ;;  %3385 = vmatmul.mubr.f32.gmra.mrb[2].mxu1 %v1588_v61  ;;  %v5309_v30 = vand.u32 4294901760, %v4927_v11 }
 0x1aa   : > { %v1795_v44 = vsub.f32 %v4875_v23, %v5352_v31  ;;  %v4949_v40 = vand.u32 4294901760, %v1442_v8  ;;  %v3952_v46 = vadd.f32 %v4799_v20, %v1400_v38  ;;  %3772 = vmatpush3.bf16.msra.mxu1 %v4839_v49  ;;  %v1598_v14 = vand.u32 4294901760, %v1597_v4 }
 0x1ab   : > { %v5312_v36 = vand.u32 4294901760, %v4934_v2  ;;  %v4955_v7 = vsub.f32 %v1443_v18, %v4942_v21  ;;  %v1445_v57 = vmax.f32 %v3951_v48, 0.0  ;;  %3774 = vmatprep.subr.bf16.mxu1 %v4844_v43  ;;  %v1608_v61 = vand.u32 4294901760, %v1607_v27 }
 0x1ac   : > { %v1627_v31 = vsub.f32 %v4927_v11, %v5309_v30  ;;  %v4962_v1 = vsub.f32 %v1442_v8, %v4949_v40  ;;  %v1444_v38 = vmax.f32 %v3952_v46, 0.0  ;;  %v3345_v63 = vpop.f32.mrb[12].mxu0  ;;  %3387 = vmatprep.mubr.f32.mxu1 %v1598_v14  ;;  %v1789_v18 = vand.u32 4294901760, %v1788_v10 }
 0x1ad   : > { %5353 = vst [vmem:[#allocation12_spill] sm:$0xff] %v4955_v7  ;;  %v1617_v49 = vsub.f32 %v4934_v2, %v5312_v36  ;;  %v4967_v4 = vand.u32 4294901760, %v1445_v57  ;;  %v3953_v48 = vadd.f32 %v3345_v63, %v4799_v20  ;;  %v1412_v27 = vpop.f32.mrb[13].mxu0  ;;  %3388 = vmatmul.mubr.f32.gmra.mrb[4].mxu1 %v1608_v61  ;;  %v5317_v60 = vand.u32 4294901760, %v4955_v7 }
 0x1ae   : > { %v1796_v30 = vand.u32 4294901760, %v1795_v44  ;;  %v4971_v37 = vand.u32 4294901760, %v1444_v38  ;;  %v3954_v46 = vadd.f32 %v4799_v20, %v1412_v27  ;;  %3776 = vmatpush3.bf16.msra.mxu1 %v4844_v43  ;;  %v5318_v8 = vand.u32 4294901760, %v4962_v1 }
 0x1af   : > { %v1618_v14 = vand.u32 4294901760, %v1617_v49  ;;  %v4977_v10 = vsub.f32 %v1445_v57, %v4967_v4  ;;  %v1447_v36 = vmax.f32 %v3953_v48, 0.0  ;;  %3778 = vmatprep.subr.bf16.mxu1 %v4853_v62  ;;  %v1628_v63 = vand.u32 4294901760, %v1627_v31 }
 0x1b0   : > { %v1647_v44 = vsub.f32 %v4955_v7, %v5317_v60  ;;  %v4984_v61 = vsub.f32 %v1444_v38, %v4971_v37  ;;  %v1446_v27 = vmax.f32 %v3954_v46, 0.0  ;;  %v3348_v6 = vpop.f32.mrb[14].mxu0  ;;  %v1637_v43 = vsub.f32 %v4962_v1, %v5318_v8 }
 0x1b1   : > { %3390 = vmatprep.mubr.f32.mxu1 %v1618_v14  ;;  %v4989_v57 = vand.u32 4294901760, %v1447_v36  ;;  %v3955_v49 = vadd.f32 %v3348_v6, %v4799_v20  ;;  %v1424_v48 = vpop.f32.mrb[15].mxu0  ;;  %v3785_v31 = vpack.c.bf16 %v1796_v30, %v1789_v18  ;;  %v1666_v16 = vand.u32 4294901760, %v4977_v10 }
 0x1b2   : > { %3391 = vmatmul.mubr.f32.gmra.mrb[6].mxu1 %v1628_v63  ;;  %v4993_v60 = vand.u32 4294901760, %v1446_v27  ;;  %v3956_v38 = vadd.f32 %v4799_v20, %v1424_v48  ;;  %v1638_v46 = vand.u32 4294901760, %v1637_v43  ;;  %v1656_v14 = vand.u32 4294901760, %v4984_v61 }
 0x1b3   : > { %3780 = vmatpush3.bf16.msra.mxu1 %v4853_v62  ;;  %v4999_v8 = vsub.f32 %v1447_v36, %v4989_v57  ;;  %v1449_v7 = vmax.f32 %v3955_v49, 0.0  ;;  %v1648_v6 = vand.u32 4294901760, %v1647_v44  ;;  %v1667_v30 = vsub.f32 %v4977_v10, %v1666_v16 }
 0x1b4   : > { %3782 = vmatprep.subr.bf16.mxu1 %v4919_v32  ;;  %v5006_v18 = vsub.f32 %v1446_v27, %v4993_v60  ;;  %v1448_v20 = vmax.f32 %v3956_v38, 0.0  ;;  %3393 = vmatprep.mubr.f32.mxu1 %v1638_v46  ;;  %v1657_v62 = vsub.f32 %v4984_v61, %v1656_v14 }
 0x1b5   : > { %v5011_v63 = vand.u32 4294901760, %v1449_v7  ;;  %v1686_v36 = vand.u32 4294901760, %v4999_v8  ;;  %v1668_v48 = vand.u32 4294901760, %v1667_v30 }
 0x1b6   : > { %3394 = vmatmul.mubr.f32.gmra.mrb[8].mxu1 %v1648_v6  ;;  %v5014_v43 = vand.u32 4294901760, %v1448_v20  ;;  %v1658_v44 = vand.u32 4294901760, %v1657_v62  ;;  %v1676_v49 = vand.u32 4294901760, %v5006_v18 }
 0x1b7   : > { %3784 = vmatpush3.bf16.msra.mxu1 %v4919_v32  ;;  %v5019_v27 = vsub.f32 %v1449_v7, %v5011_v63  ;;  %v1687_v38 = vsub.f32 %v4999_v8, %v1686_v36 }
 0x1b8   : > { %3786 = vmatprep.subr.bf16.mxu1 %v3785_v31  ;;  %v5025_v46 = vsub.f32 %v1448_v20, %v5014_v43  ;;  %3396 = vmatprep.mubr.f32.mxu1 %v1658_v44  ;;  %v1677_v32 = vsub.f32 %v5006_v18, %v1676_v49 }
 0x1b9   : > { %v5321_v6 = vand.u32 4294901760, %v5019_v27  ;;  %v1688_v30 = vand.u32 4294901760, %v1687_v38  ;;  %v3801_v38 = vpack.c.bf16 %v4768_v12, %v4763_v56 }
 0x1ba   : > { %3397 = vmatmul.mubr.f32.gmra.mrb[10].mxu1 %v1668_v48  ;;  %v1678_v7 = vand.u32 4294901760, %v1677_v32  ;;  %v5322_v62 = vand.u32 4294901760, %v5025_v46  ;;  %v3817_v32 = vpack.c.bf16 %v4875_v23, %v4866_v53 }
 0x1bb   : > { %3788 = vmatpush3.bf16.msra.mxu1 %v3785_v31  ;;  %v1707_v20 = vsub.f32 %v5019_v27, %v5321_v6 }
 0x1bc   : > { %3790 = vmatprep.subr.bf16.mxu1 %v4738_v13  ;;  %3399 = vmatprep.mubr.f32.mxu1 %v1678_v7  ;;  %v1697_v44 = vsub.f32 %v5025_v46, %v5322_v62  ;;  %v5356_v7 = vld [vmem:[#allocation3_spill] sm:$0xff]  ;;  %v5366_v62 = vand.u32 4294901760, %v4842_v3 }
 0x1bd   : > { %v1708_v31 = vand.u32 4294901760, %v1707_v20  ;;  %v5358_v20 = vld [vmem:[#allocation5_spill] sm:$0xff] }
 0x1be   : > { %3400 = vmatmul.mubr.f32.gmra.mrb[12].mxu1 %v1688_v30  ;;  %v1698_v48 = vand.u32 4294901760, %v1697_v44  ;;  %v5357_v30 = vld [vmem:[#allocation4_spill] sm:$0xff]  ;;  %v5359_v44 = vld [vmem:[#allocation6_spill] sm:$0xff] }
 0x1bf   : > { %3792 = vmatpush3.bf16.msra.mxu1 %v4738_v13  ;;  %v3805_v13 = vpack.c.bf16 %v4778_v47, %v4773_v35 }
 0x1c0   : > { %3794 = vmatprep.subr.bf16.mxu1 %v4746_v50  ;;  %3402 = vmatprep.mubr.f32.mxu1 %v1698_v48  ;;  %v5360_v48 = vand.u32 4294901760, %v5359_v44  ;;  %v5367_v44 = vand.u32 4294901760, %v4884_v15 }
 0x1c2   : > { %3403 = vmatmul.mubr.f32.gmra.mrb[14].mxu1 %v1708_v31  ;;  %v5361_v31 = vld [vmem:[#allocation7_spill] sm:$0xff] }
 0x1c3   : > { %3796 = vmatpush3.bf16.msra.mxu1 %v4746_v50  ;;  %3437 = vmatprep.mubr.f32.mxu1 %v4836_v45  ;;  %v3809_v50 = vpack.c.bf16 %v4788_v17, %v4783_v26 }
 0x1c4   : > { %3798 = vmatprep.subr.bf16.mxu1 %v4750_v51 }
 0x1c6   : > { %3438 = vmatmul.mubr.f32.vlgmr.msra.gmra.mrb[0].mxu1 %v4833_v22 }
 0x1c7   : > { %3800 = vmatpush3.bf16.msra.mxu1 %v4750_v51  ;;  %3440 = vmatprep.mubr.f32.mxu1 %v4868_v25  ;;  %v3813_v51 = vpack.c.bf16 %v4827_v41, %v4816_v33 }
 0x1c8   : > { %3802 = vmatprep.subr.bf16.mxu1 %v3801_v38 }
 0x1ca   : > { %3441 = vmatmul.mubr.f32.gmra.mrb[2].mxu1 %v4858_v55 }
 0x1cb   : > { %3804 = vmatpush3.bf16.msra.mxu1 %v3801_v38  ;;  %3443 = vmatprep.mubr.f32.mxu1 %v4896_v5  ;;  %v5362_v38 = vand.u32 4294901760, %v5361_v31  ;;  %v5369_v31 = vand.u32 4294901760, %v4778_v47  ;;  %v5376_v47 = vand.u32 4294901760, %v4816_v33  ;;  %v5383_v33 = vld [vmem:[#allocation8_spill] sm:$0xff] }
 0x1cc   : > { %3806 = vmatprep.subr.bf16.mxu1 %v3805_v13 }
 0x1ce   : > { %3444 = vmatmul.mubr.f32.gmra.mrb[4].mxu1 %v4890_v28 }
 0x1cf   : > { %3808 = vmatpush3.bf16.msra.mxu1 %v3805_v13  ;;  %3446 = vmatprep.mubr.f32.mxu1 %v4921_v0  ;;  %v3861_v13 = vpack.c.bf16 %v5362_v38, %v5360_v48  ;;  %v5368_v48 = vand.u32 4294901760, %v4773_v35  ;;  %v5370_v38 = vand.u32 4294901760, %v4878_v39  ;;  %v5375_v35 = vand.u32 4294901760, %v4934_v2 }
 0x1d0   : > { %3810 = vmatprep.subr.bf16.mxu1 %v3809_v50 }
 0x1d2   : > { %3447 = vmatmul.mubr.f32.gmra.mrb[6].mxu1 %v4914_v29 }
 0x1d3   : > { %3812 = vmatpush3.bf16.msra.mxu1 %v3809_v50  ;;  %3449 = vmatprep.mubr.f32.mxu1 %v4949_v40  ;;  %v5363_v50 = vand.u32 4294901760, %v4850_v24 }
 0x1d4   : > { %3814 = vmatprep.subr.bf16.mxu1 %v3813_v51 }
 0x1d6   : > { %3450 = vmatmul.mubr.f32.gmra.mrb[8].mxu1 %v4942_v21 }
 0x1d7   : > { %3816 = vmatpush3.bf16.msra.mxu1 %v3813_v51  ;;  %3452 = vmatprep.mubr.f32.mxu1 %v4971_v37  ;;  %v5364_v51 = vand.u32 4294901760, %v4763_v56  ;;  %v5371_v56 = vand.u32 4294901760, %v4907_v42 }
 0x1d8   : > { %3818 = vmatprep.subr.bf16.mxu1 %v3817_v32 }
 0x1da   : > { %3453 = vmatmul.mubr.f32.gmra.mrb[10].mxu1 %v4967_v4 }
 0x1db   : > { %3820 = vmatpush3.bf16.msra.mxu1 %v3817_v32  ;;  %3455 = vmatprep.mubr.f32.mxu1 %v4993_v60  ;;  %v5365_v32 = vand.u32 4294901760, %v4768_v12  ;;  %v5372_v12 = vand.u32 4294901760, %v4783_v26  ;;  %v5379_v26 = vand.u32 4294901760, %v4962_v1 }
 0x1dc   : > { %3822 = vmatprep.subr.bf16.mxu1 %v4754_v52 }
 0x1dd   : > { %v3865_v6 = vpack.c.bf16 %v5365_v32, %v5364_v51 }
 0x1de   : > { %3456 = vmatmul.mubr.f32.gmra.mrb[12].mxu1 %v4989_v57 }
 0x1df   : > { %3824 = vmatpush3.bf16.msra.mxu1 %v4754_v52  ;;  %3458 = vmatprep.mubr.f32.mxu1 %v5014_v43  ;;  %v5354_v52 = vld [vmem:[#allocation2_spill] sm:$0xff] }
 0x1e0   : > { %3826 = vmatprep.subr.bf16.mxu1 %v4758_v54 }
 0x1e2   : > { %3459 = vmatmul.mubr.f32.gmra.mrb[14].mxu1 %v5011_v63 }
 0x1e3   : > { %3828 = vmatpush3.bf16.msra.mxu1 %v4758_v54  ;;  %3493 = vmatprep.mubr.f32.mxu1 %v4850_v24  ;;  %v5355_v54 = vld [vmem:[#allocation12_spill] sm:$0xff]  ;;  %v3869_v24 = vpack.c.bf16 %v5369_v31, %v5368_v48 }
 0x1e4   : > { %3830 = vmatprep.subr.bf16.mxu1 %v4492_v58 }
 0x1e6   : > { %3494 = vmatmul.mubr.f32.vlgmr.msra.gmra.mrb[0].mxu1 %v4842_v3  ;;  %v5373_v3 = vand.u32 4294901760, %v4788_v17  ;;  %v5380_v17 = vand.u32 4294901760, %v4866_v53  ;;  %v5387_v53 = vld [vmem:[#allocation10_spill] sm:$0xff] }
 0x1e7   : > { %3832 = vmatpush3.bf16.msra.mxu1 %v4492_v58  ;;  %3496 = vmatprep.mubr.f32.mxu1 %v4884_v15 }
 0x1e8   : > { %3834 = vmatprep.subr.bf16.mxu1 %v4501_v59  ;;  %v3873_v15 = vpack.c.bf16 %v5373_v3, %v5372_v12 }
 0x1ea   : > { %3497 = vmatmul.mubr.f32.gmra.mrb[2].mxu1 %v4878_v39  ;;  %v5377_v39 = vand.u32 4294901760, %v4827_v41  ;;  %v5384_v41 = vand.u32 4294901760, %v5383_v33 }
 0x1eb   : > { %3836 = vmatpush3.bf16.msra.mxu1 %v4501_v59  ;;  %3499 = vmatprep.mubr.f32.mxu1 %v4907_v42 }
 0x1ec   : > { %3838 = vmatprep.subr.bf16.mxu1 %v4526_v34  ;;  %v3877_v42 = vpack.c.bf16 %v5377_v39, %v5376_v47 }
 0x1ee   : > { %3500 = vmatmul.mubr.f32.gmra.mrb[4].mxu1 %v4901_v19 }
 0x1ef   : > { %3840 = vmatpush3.bf16.msra.mxu1 %v4526_v34  ;;  %3502 = vmatprep.mubr.f32.mxu1 %v4934_v2 }
 0x1f0   : > { %3842 = vmatprep.subr.bf16.mxu1 %v4548_v9 }
 0x1f2   : > { %3503 = vmatmul.mubr.f32.gmra.mrb[6].mxu1 %v4927_v11 }
 0x1f3   : > { %3844 = vmatpush3.bf16.msra.mxu1 %v4548_v9  ;;  %3505 = vmatprep.mubr.f32.mxu1 %v4962_v1 }
 0x1f4   : > { %3846 = vmatprep.subr.bf16.mxu1 %v5354_v52 }
 0x1f6   : > { %3506 = vmatmul.mubr.f32.gmra.mrb[8].mxu1 %v5355_v54 }
 0x1f7   : > { %3848 = vmatpush3.bf16.msra.mxu1 %v5354_v52  ;;  %3508 = vmatprep.mubr.f32.mxu1 %v4984_v61 }
 0x1f8   : > { %3850 = vmatprep.subr.bf16.mxu1 %v5356_v7 }
 0x1fa   : > { %3509 = vmatmul.mubr.f32.gmra.mrb[10].mxu1 %v4977_v10 }
 0x1fb   : > { %3852 = vmatpush3.bf16.msra.mxu1 %v5356_v7  ;;  %3511 = vmatprep.mubr.f32.mxu1 %v5006_v18 }
 0x1fc   : > { %3854 = vmatprep.subr.bf16.mxu1 %v5357_v30 }
 0x1fe   : > { %3512 = vmatmul.mubr.f32.gmra.mrb[12].mxu1 %v4999_v8 }
 0x1ff   : > { %3856 = vmatpush3.bf16.msra.mxu1 %v5357_v30  ;;  %3514 = vmatprep.mubr.f32.mxu1 %v5025_v46 }
 0x200   : > { %3858 = vmatprep.subr.bf16.mxu1 %v5358_v20 }
 0x202   : > { %3515 = vmatmul.mubr.f32.gmra.mrb[14].mxu1 %v5019_v27 }
 0x203   : > { %3860 = vmatpush3.bf16.msra.mxu1 %v5358_v20  ;;  %3549 = vmatprep.mubr.f32.mxu1 %v5363_v50 }
 0x204   : > { %3862 = vmatprep.subr.bf16.mxu1 %v3861_v13 }
 0x206   : > { %3550 = vmatmul.mubr.f32.vlgmr.msra.gmra.mrb[0].mxu1 %v5366_v62  ;;  %v5374_v62 = vand.u32 4294901760, %v4901_v19  ;;  %v5381_v19 = vand.u32 4294901760, %v4875_v23  ;;  %v5388_v23 = vand.u32 4294901760, %v5387_v53 }
 0x207   : > { %3864 = vmatpush3.bf16.msra.mxu1 %v3861_v13  ;;  %3552 = vmatprep.mubr.f32.mxu1 %v5367_v44  ;;  %v5382_v13 = vand.u32 4294901760, %v5355_v54  ;;  %v5389_v54 = vld [vmem:[#allocation11_spill] sm:$0xff] }
 0x208   : > { %3866 = vmatprep.subr.bf16.mxu1 %v3865_v6  ;;  %v3881_v2 = vpack.c.bf16 %v5381_v19, %v5380_v17  ;;  %v5390_v51 = vand.u32 4294901760, %v5389_v54 }
 0x20a   : > { %3553 = vmatmul.mubr.f32.gmra.mrb[2].mxu1 %v5370_v38  ;;  %v3889_v61 = vpack.c.bf16 %v5390_v51, %v5388_v23 }
 0x20b   : > { %3868 = vmatpush3.bf16.msra.mxu1 %v3865_v6  ;;  %3555 = vmatprep.mubr.f32.mxu1 %v5371_v56  ;;  %v5378_v6 = vand.u32 4294901760, %v4927_v11  ;;  %v5385_v11 = vld [vmem:[#allocation9_spill] sm:$0xff] }
 0x20c   : > { %3870 = vmatprep.subr.bf16.mxu1 %v3869_v24  ;;  %v5386_v50 = vand.u32 4294901760, %v5385_v11 }
 0x20e   : > { %3556 = vmatmul.mubr.f32.gmra.mrb[4].mxu1 %v5374_v62  ;;  %v3885_v1 = vpack.c.bf16 %v5386_v50, %v5384_v41 }
 0x20f   : > { %3872 = vmatpush3.bf16.msra.mxu1 %v3869_v24  ;;  %3558 = vmatprep.mubr.f32.mxu1 %v5375_v35 }
 0x210   : > { %3874 = vmatprep.subr.bf16.mxu1 %v3873_v15 }
 0x212   : > { %3559 = vmatmul.mubr.f32.gmra.mrb[6].mxu1 %v5378_v6 }
 0x213   : > { %3876 = vmatpush3.bf16.msra.mxu1 %v3873_v15  ;;  %3561 = vmatprep.mubr.f32.mxu1 %v5379_v26 }
 0x214   : > { %3878 = vmatprep.subr.bf16.mxu1 %v3877_v42 }
 0x216   : > { %3562 = vmatmul.mubr.f32.gmra.mrb[8].mxu1 %v5382_v13 }
 0x217   : > { %3880 = vmatpush3.bf16.msra.mxu1 %v3877_v42  ;;  %3564 = vmatprep.mubr.f32.mxu1 %v1656_v14  ;;  %v5391_v14 = vand.u32 4294901760, %v5025_v46 }
 0x218   : > { %3882 = vmatprep.subr.bf16.mxu1 %v3881_v2 }
 0x21a   : > { %3565 = vmatmul.mubr.f32.gmra.mrb[10].mxu1 %v1666_v16  ;;  %v5392_v16 = vand.u32 4294901760, %v5019_v27 }
 0x21b   : > { %3884 = vmatpush3.bf16.msra.mxu1 %v3881_v2  ;;  %3567 = vmatprep.mubr.f32.mxu1 %v1676_v49 }
 0x21c   : > { %3886 = vmatprep.subr.bf16.mxu1 %v3885_v1 }
 0x21e   : > { %3568 = vmatmul.mubr.f32.gmra.mrb[12].mxu1 %v1686_v36 }
 0x21f   : > { %3888 = vmatpush3.bf16.msra.mxu1 %v3885_v1  ;;  %3570 = vmatprep.mubr.f32.mxu1 %v5391_v14 }
 0x220   : > { %3890 = vmatprep.subr.bf16.mxu1 %v3889_v61 }
 0x222   : > { %3571 = vmatmul.mubr.f32.gmra.mrb[14].mxu1 %v5392_v16 }
 0x223   : > { %3892 = vmatpush3.bf16.msra.mxu1 %v3889_v61  ;;  %3605 = vmatprep.mubr.f32.mxu1 %v4836_v45 }
 0x224   : > { %3925 = vmatprep.subr.bf16.mxu1 %v4492_v58 }
 0x226   : > { %3606 = vmatmul.mubr.f32.vlgmr.msra.gmra.mrb[0].mxu1 %v4833_v22 }
 0x227   : > { %3933 = vmatpush3.bf16.msra.mxu1 %v4492_v58  ;;  %3608 = vmatprep.mubr.f32.mxu1 %v4868_v25 }
 0x228   : > { %3926 = vmatprep.subr.bf16.mxu1 %v4501_v59 }
 0x22a   : > { %3609 = vmatmul.mubr.f32.gmra.mrb[2].mxu1 %v4858_v55 }
 0x22b   : > { %3934 = vmatpush3.bf16.msra.mxu1 %v4501_v59  ;;  %3611 = vmatprep.mubr.f32.mxu1 %v4896_v5 }
 0x22c   : > { %3927 = vmatprep.subr.bf16.mxu1 %v4526_v34 }
 0x22e   : > { %3612 = vmatmul.mubr.f32.gmra.mrb[4].mxu1 %v4890_v28 }
 0x22f   : > { %3935 = vmatpush3.bf16.msra.mxu1 %v4526_v34  ;;  %3614 = vmatprep.mubr.f32.mxu1 %v4921_v0 }
 0x230   : > { %3928 = vmatprep.subr.bf16.mxu1 %v4548_v9 }
 0x232   : > { %3615 = vmatmul.mubr.f32.gmra.mrb[6].mxu1 %v4914_v29 }
 0x233   : > { %3936 = vmatpush3.bf16.msra.mxu1 %v4548_v9  ;;  %3617 = vmatprep.mubr.f32.mxu1 %v4949_v40 }
 0x234   : > { %3929 = vmatprep.subr.bf16.mxu1 %v5354_v52 }
 0x236   : > { %3618 = vmatmul.mubr.f32.gmra.mrb[8].mxu1 %v4942_v21 }
 0x237   : > { %3937 = vmatpush3.bf16.msra.mxu1 %v5354_v52  ;;  %3620 = vmatprep.mubr.f32.mxu1 %v4971_v37 }
 0x238   : > { %3930 = vmatprep.subr.bf16.mxu1 %v5356_v7 }
 0x23a   : > { %3621 = vmatmul.mubr.f32.gmra.mrb[10].mxu1 %v4967_v4 }
 0x23b   : > { %3938 = vmatpush3.bf16.msra.mxu1 %v5356_v7  ;;  %3623 = vmatprep.mubr.f32.mxu1 %v4993_v60 }
 0x23c   : > { %3931 = vmatprep.subr.bf16.mxu1 %v5357_v30 }
 0x23e   : > { %3624 = vmatmul.mubr.f32.gmra.mrb[12].mxu1 %v4989_v57 }
 0x23f   : > { %3939 = vmatpush3.bf16.msra.mxu1 %v5357_v30  ;;  %3626 = vmatprep.mubr.f32.mxu1 %v5014_v43 }
 0x240   : > { %3932 = vmatprep.subr.bf16.mxu1 %v5358_v20 }
 0x242   : > { %3627 = vmatmul.mubr.f32.gmra.mrb[14].mxu1 %v5011_v63 }
 0x243   : > { %3940 = vmatpush3.bf16.msra.mxu1 %v5358_v20  ;;  %3670 = vmatprep.mubr.f32.mxu1 %v4921_v0 }
 0x246   : > { %3671 = vmatmul.mubr.f32.vlgmr.msra.gmra.mrb[6].mxu1 %v4914_v29 }
 0x247   : > { %3673 = vmatprep.mubr.f32.mxu1 %v4949_v40 }
 0x24a   : > { %3674 = vmatmul.mubr.f32.gmra.mrb[8].mxu1 %v4942_v21 }
 0x24b   : > { %3676 = vmatprep.mubr.f32.mxu1 %v4971_v37  ;;  %v2842_v37 = vld [vmem:[%s5261_s4] ss:$0 sm:$0xff] }
 0x24e   : > { %3677 = vmatmul.mubr.f32.gmra.mrb[10].mxu1 %v4967_v4 }
 0x24f   : > { %3679 = vmatprep.mubr.f32.mxu1 %v4993_v60 }
 0x252   : > { %3680 = vmatmul.mubr.f32.gmra.mrb[12].mxu1 %v4989_v57 }
 0x253   : > { %3682 = vmatprep.mubr.f32.mxu1 %v5014_v43 }
 0x256   : > { %3683 = vmatmul.mubr.f32.gmra.mrb[14].mxu1 %v5011_v63 }
 0x270   : > { %v3663_v9 = vpop.f32.mrb[16].mxu0 }
 0x271   : > { %v2665_v34 = vpop.f32.mrb[17].mxu0 }
 0x274   : > { %v3666_v58 = vpop.f32.mrb[18].mxu0 }
 0x275   : > { %v2677_v59 = vpop.f32.mrb[19].mxu0 }
 0x278   : > { %v3669_v45 = vpop.f32.mrb[20].mxu0 }
 0x279   : > { %v2689_v22 = vpop.f32.mrb[21].mxu0 }
 0x2f9   : > { %v3607_v55 = vpop.f32.mrb[0].mxu1 }
 0x2fa   : > { %v3957_v25 = vadd.f32 %v3607_v55, %v2842_v37  ;;  %v2488_v28 = vpop.f32.mrb[1].mxu1 }
 0x2fb   : > { %v3959_v60 = vadd.f32 %v2842_v37, %v2488_v28 }
 0x2fc   : > { %v3958_v5 = vadd.f32 %v3957_v25, %v3663_v9 }
 0x2fd   : > { %v3960_v29 = vadd.f32 %v3959_v60, %v2665_v34  ;;  %v3610_v40 = vpop.f32.mrb[2].mxu1 }
 0x2fe   : > { %2761 = vst.msk [vmem:[%s5220_s25 + $0x8] sm:$0xff] %vm2759_vm1, %v3958_v5  ;;  %v3961_v0 = vadd.f32 %v3610_v40, %v2842_v37  ;;  %v2500_v21 = vpop.f32.mrb[3].mxu1 }
 0x2ff   : > { %2760 = vst.msk [vmem:[%s5220_s25] sm:$0xff] %vm2759_vm1, %v3960_v29  ;;  %v3963_v4 = vadd.f32 %v2842_v37, %v2500_v21 }
 0x300   : > { %v3962_v8 = vadd.f32 %v3961_v0, %v3666_v58 }
 0x301   : > { %v3964_v10 = vadd.f32 %v3963_v4, %v2677_v59  ;;  %v3613_v57 = vpop.f32.mrb[4].mxu1 }
 0x302   : > { %2763 = vst.msk [vmem:[%s5220_s25 + $0x18] sm:$0xff] %vm2759_vm1, %v3962_v8  ;;  %v3965_v18 = vadd.f32 %v3613_v57, %v2842_v37  ;;  %v2512_v63 = vpop.f32.mrb[5].mxu1 }
 0x303   : > { %2762 = vst.msk [vmem:[%s5220_s25 + $0x10] sm:$0xff] %vm2759_vm1, %v3964_v10  ;;  %v3967_v36 = vadd.f32 %v2842_v37, %v2512_v63 }
 0x304   : > { %v3966_v43 = vadd.f32 %v3965_v18, %v3669_v45 }
 0x305   : > { %v3968_v49 = vadd.f32 %v3967_v36, %v2689_v22 }
 0x306   : > { %2765 = vst.msk [vmem:[%s5220_s25 + $0x28] sm:$0xff] %vm2759_vm1, %v3966_v43 }
 0x307   : > { %2764 = vst.msk [vmem:[%s5220_s25 + $0x20] sm:$0xff] %vm2759_vm1, %v3968_v49 }
 0x319   : > { %v3672_v27 = vpop.f32.mrb[6].mxu1 }
 0x31a   : > { %v3969_v46 = vadd.f32 %v3672_v27, %v2842_v37  ;;  %v2701_v52 = vpop.f32.mrb[7].mxu1 }
 0x31b   : > { %v3970_v7 = vadd.f32 %v2842_v37, %v2701_v52 }
 0x31c   : > { %2767 = vst.msk [vmem:[%s5220_s25 + $0x38] sm:$0xff] %vm2759_vm1, %v3969_v46 }
 0x31d   : > { %2766 = vst.msk [vmem:[%s5220_s25 + $0x30] sm:$0xff] %vm2759_vm1, %v3970_v7  ;;  %v3675_v30 = vpop.f32.mrb[8].mxu1 }
 0x31e   : > { %v3971_v20 = vadd.f32 %v3675_v30, %v2842_v37  ;;  %v2713_v32 = vpop.f32.mrb[9].mxu1 }
 0x31f   : > { %v3972_v44 = vadd.f32 %v2842_v37, %v2713_v32 }
 0x320   : > { %2769 = vst.msk [vmem:[%s5220_s25 + $0x48] sm:$0xff] %vm2759_vm1, %v3971_v20 }
 0x321   : > { %2768 = vst.msk [vmem:[%s5220_s25 + $0x40] sm:$0xff] %vm2759_vm1, %v3972_v44  ;;  %v3678_v48 = vpop.f32.mrb[10].mxu1 }
 0x322   : > { %v3973_v31 = vadd.f32 %v3678_v48, %v2842_v37  ;;  %v2725_v24 = vpop.f32.mrb[11].mxu1 }
 0x323   : > { %v3974_v38 = vadd.f32 %v2842_v37, %v2725_v24 }
 0x324   : > { %2771 = vst.msk [vmem:[%s5220_s25 + $0x58] sm:$0xff] %vm2759_vm1, %v3973_v31 }
 0x325   : > { %2770 = vst.msk [vmem:[%s5220_s25 + $0x50] sm:$0xff] %vm2759_vm1, %v3974_v38  ;;  %v3681_v56 = vpop.f32.mrb[12].mxu1 }
 0x326   : > { %v3975_v12 = vadd.f32 %v3681_v56, %v2842_v37  ;;  %v2737_v3 = vpop.f32.mrb[13].mxu1 }
 0x327   : > { %v3976_v15 = vadd.f32 %v2842_v37, %v2737_v3 }
 0x328   : > { %2773 = vst.msk [vmem:[%s5220_s25 + $0x68] sm:$0xff] %vm2759_vm1, %v3975_v12 }
 0x329   : > { %2772 = vst.msk [vmem:[%s5220_s25 + $0x60] sm:$0xff] %vm2759_vm1, %v3976_v15  ;;  %v3684_v62 = vpop.f32.mrb[14].mxu1 }
 0x32a   : > { %v3977_v35 = vadd.f32 %v3684_v62, %v2842_v37  ;;  %v2749_v47 = vpop.f32.mrb[15].mxu1 }
 0x32b   : > { %v3978_v39 = vadd.f32 %v2842_v37, %v2749_v47 }
 0x32c   : > { %2775 = vst.msk [vmem:[%s5220_s25 + $0x78] sm:$0xff] %vm2759_vm1, %v3977_v35 }
 0x32d   : > { %2774 = vst.msk [vmem:[%s5220_s25 + $0x70] sm:$0xff] %vm2759_vm1, %v3978_v39 }
 0x32e PF: > { %s15_s18 = sadd.s32 1, %s4147_s18  }
 0x32f   : > { %p12_p4 = scmp.ge.s32.totalorder %s15_s18, 4  }
 0x331   :  { %14 = sbr.rel (!%p12_p4) target bundleno = 1 (0x1), region = 70 }

</bundles_post_ra>
